<compile_context>
chip_gen: v7x
topology: tpu7x:2x2x1
jax: 0.10.0
libtpu: 0.0.40
codegen_flags: <defaults>
</compile_context>

<pallas_src>
import functools

import jax
import jax.numpy as jnp
from jax import lax
from jax.experimental import pallas as pl
from jax.experimental.pallas import tpu as pltpu


# -------------------- Pallas kernels --------------------

def conv_stats_kernel(w_ref, x_ref, mask_ref, y_ref, stat_ref, acc_ref, *,
                      tap_offsets, tile_q):
    """Direct conv: per-tap (Cout,Cin)@(Cin,tile_q) accumulate + BN partial stats.

    x_ref holds a bf16 slab of the flattened, zero-padded input covering this
    spatial tile plus a halo, so every tap is a *static* lane-offset slice.
    """
    acc_ref[...] = jnp.zeros_like(acc_ref)
    for t, off in enumerate(tap_offsets):                 # static, unrolled taps
        xs = x_ref[0, 0, :, off:off + tile_q]             # (Cin, tile_q) bf16
        acc_ref[...] += jnp.dot(w_ref[t], xs.astype(jnp.float32),
                                preferred_element_type=jnp.float32)
    y = acc_ref[...]                                      # (Cout, tile_q) f32
    y_ref[...] = y.astype(y_ref.dtype)[None]              # lane-dense bf16 store

    # BN batch statistics over *valid* columns only (the wide layout carries
    # Wp - Wout junk columns per output row; the bf16 mask zeroes them).
    ym = y * mask_ref[...]                                # (Cout, tile_q) f32
    stat_ref[0, 0, :, 0:1] = jnp.sum(ym, axis=1, keepdims=True)
    stat_ref[0, 0, :, 1:2] = jnp.sum(ym * y, axis=1, keepdims=True)


def bn_relu_kernel(y_ref, scale_ref, shift_ref, o_ref, *, w_out):
    """Fused affine batch-norm + ReLU; drops the wide-layout junk columns."""
    y = y_ref[:, :, :, :w_out].astype(jnp.float32)        # static lane slice
    o_ref[...] = jnp.maximum(y * scale_ref[...] + shift_ref[...], 0.0)


# -------------------- helpers --------------------

def _pick_tile(total, target):
    """Largest tile <= target that divides `total` and is a multiple of 128."""
    if total <= target:
        return total
    t = (target // 128) * 128
    while t >= 128:
        if total % t == 0:
            return t
        t -= 128
    # TODO(synk): no lane-dense divisor of the wide spatial dim; a single
    # full-extent block is still correct but may be large for huge images.
    return total


def _pick_row_tile(hout, bytes_per_row, target_bytes):
    """Row tile for the BN+ReLU pass: multiple of 8 dividing Hout (or Hout)."""
    rows = max(1, target_bytes // max(bytes_per_row, 1))
    if hout <= rows:
        return hout
    t = (rows // 8) * 8
    while t >= 8:
        if hout % t == 0:
            return t
        t -= 8
    return hout


def _vmem_limit(need_bytes):
    """Generation-aware VMEM request: footprint + headroom, capped well below
    the physical capacity (v7x has only 64 MiB per TensorCore; v5e/v6e 128)."""
    cap = None
    try:
        cap = getattr(pltpu.get_tpu_info(), "vmem_capacity_bytes", None)
    except Exception:
        cap = None
    if not cap:
        cap = 64 * 1024 * 1024
    budget = (3 * cap) // 4                 # never request the whole VMEM
    return int(max(16 << 20, min(need_bytes + (8 << 20), budget)))


# -------------------- wrapper --------------------

@functools.partial(jax.jit,
                   static_argnames=("stride", "dilation", "eps", "tile_q_target"))
def conv2d_bn_relu(x_nchw, weight_oihw, gamma, beta, *, stride=1, dilation=1,
                   eps=1e-5, tile_q_target=16384):
    # TODO(synk): stride > 1 needs a strided output gather on top of the
    # flat-shift direct conv; only the module default stride=1 is supported.
    if stride != 1:
        raise NotImplementedError("stride > 1 not supported by this kernel")

    N, Cin, H, W = x_nchw.shape
    Cout, Cin_w, KH, KW = weight_oihw.shape
    assert Cin == Cin_w
    d = dilation
    pad = (KH - 1) // 2                       # same rule as the PyTorch module
    Hp, Wp = H + 2 * pad, W + 2 * pad
    Hout, Wout = Hp - d * (KH - 1), Wp - d * (KW - 1)
    KT = KH * KW
    Lq = Hout * Wp                            # "wide" spatial length per image
    max_off = (KH - 1) * d * Wp + (KW - 1) * d

    # ---- tiling over the wide spatial axis (lane-dense) ----
    tile_q = _pick_tile(Lq, tile_q_target)
    n_q = Lq // tile_q
    slab_len = tile_q + max_off

    # ---- flattened zero-padded bf16 input + per-tile halo slabs (~1x bytes) ----
    xp = jnp.pad(x_nchw, ((0, 0), (0, 0), (pad, pad), (pad, pad)))
    x_flat = xp.astype(jnp.bfloat16).reshape(N, Cin, Hp * Wp)
    x_flat = jnp.pad(x_flat, ((0, 0), (0, 0), (0, (KW - 1) * d)))
    slabs = jnp.stack(
        [x_flat[:, :, i * tile_q:i * tile_q + slab_len] for i in range(n_q)],
        axis=1)                               # (N, n_q, Cin, slab_len)

    # per-tap weights (KH, KW, Cout, Cin) -> (KT, Cout, Cin); kept f32 (tiny)
    w_taps = jnp.transpose(weight_oihw, (2, 3, 0, 1)).reshape(KT, Cout, Cin)
    w_taps = w_taps.astype(jnp.float32)
    tap_offsets = tuple(kh * d * Wp + kw * d
                        for kh in range(KH) for kw in range(KW))

    # valid-column mask (q % Wp >= Wout are junk columns, excluded from stats)
    mask = ((jnp.arange(Lq, dtype=jnp.int32) % Wp) < Wout)
    mask = mask.astype(jnp.bfloat16).reshape(1, Lq)

    # ---- kernel 1: direct conv + merged BN partial statistics ----
    k1_step = (Cin * slab_len * 2 + tile_q * 2 + KT * Cout * Cin * 4
               + Cout * tile_q * 2 + Cout * 2 * 4)
    vmem1 = _vmem_limit(2 * k1_step + Cout * tile_q * 4)
    y_wide, stats = pl.pallas_call(
        functools.partial(conv_stats_kernel, tap_offsets=tap_offsets,
                          tile_q=tile_q),
        out_shape=(jax.ShapeDtypeStruct((N, Cout, Lq), jnp.bfloat16),
                   jax.ShapeDtypeStruct((N, n_q, Cout, 2), jnp.float32)),
        grid_spec=pltpu.PrefetchScalarGridSpec(
            num_scalar_prefetch=0,
            grid=(N, n_q),
            in_specs=[
                pl.BlockSpec((KT, Cout, Cin), lambda n, i: (0, 0, 0)),
                pl.BlockSpec((1, 1, Cin, slab_len), lambda n, i: (n, i, 0, 0)),
                pl.BlockSpec((1, tile_q), lambda n, i: (0, i)),
            ],
            out_specs=[
                pl.BlockSpec((1, Cout, tile_q), lambda n, i: (n, 0, i)),
                pl.BlockSpec((1, 1, Cout, 2), lambda n, i: (n, i, 0, 0)),
            ],
            scratch_shapes=[pltpu.VMEM((Cout, tile_q), jnp.float32)],
        ),
        compiler_params=pltpu.CompilerParams(
            dimension_semantics=("parallel", "parallel"),
            vmem_limit_bytes=vmem1),
    )(w_taps, slabs, mask)

    # ---- BN statistics -> affine scale/shift (tiny, plain JAX) ----
    count = jnp.float32(N * Hout * Wout)
    s = jnp.sum(stats[..., 0], axis=(0, 1))          # (Cout,)
    ssq = jnp.sum(stats[..., 1], axis=(0, 1))        # (Cout,)
    mean = s / count
    var = jnp.maximum(ssq / count - mean * mean, 0.0)   # clamp cancellation
    inv_std = lax.rsqrt(var + eps)
    g = gamma.astype(jnp.float32)
    b = beta.astype(jnp.float32)
    scale = (g * inv_std).reshape(1, Cout, 1, 1)
    shift = (b - mean * g * inv_std).reshape(1, Cout, 1, 1)

    # ---- kernel 2: fused BN affine + ReLU, writing final NCHW directly ----
    y4 = y_wide.reshape(N, Cout, Hout, Wp)              # metadata-only reshape
    tile_h = _pick_row_tile(Hout, Cout * Wp * 4, 4 << 20)
    n_h = Hout // tile_h
    k2_step = Cout * tile_h * (Wp * 2 + Wout * 4) + 2 * Cout * 4
    vmem2 = _vmem_limit(2 * k2_step)
    out = pl.pallas_call(
        functools.partial(bn_relu_kernel, w_out=Wout),
        out_shape=jax.ShapeDtypeStruct((N, Cout, Hout, Wout), jnp.float32),
        grid_spec=pltpu.PrefetchScalarGridSpec(
            num_scalar_prefetch=0,
            grid=(N, n_h),
            in_specs=[
                pl.BlockSpec((1, Cout, tile_h, Wp), lambda n, h: (n, 0, h, 0)),
                pl.BlockSpec((1, Cout, 1, 1), lambda n, h: (0, 0, 0, 0)),
                pl.BlockSpec((1, Cout, 1, 1), lambda n, h: (0, 0, 0, 0)),
            ],
            out_specs=pl.BlockSpec((1, Cout, tile_h, Wout),
                                   lambda n, h: (n, 0, h, 0)),
        ),
        compiler_params=pltpu.CompilerParams(
            dimension_semantics=("parallel", "parallel"),
            vmem_limit_bytes=vmem2),
    )(y4, scale, shift)
    return out


# -------------------- pure-JAX reference --------------------

def reference(x, w, gamma, beta, *, stride=1, dilation=1, eps=1e-5):
    pad = (w.shape[2] - 1) // 2
    y = lax.conv_general_dilated(
        x, w, window_strides=(stride, stride),
        padding=((pad, pad), (pad, pad)),
        rhs_dilation=(dilation, dilation),
        dimension_numbers=("NCHW", "OIHW", "NCHW"))
    mean = jnp.mean(y, axis=(0, 2, 3), keepdims=True)
    var = jnp.mean((y - mean) ** 2, axis=(0, 2, 3), keepdims=True)
    yhat = (y - mean) / jnp.sqrt(var + eps)
    yhat = yhat * gamma.reshape(1, -1, 1, 1) + beta.reshape(1, -1, 1, 1)
    return jnp.maximum(yhat, 0.0)


# -------------------- main --------------------

if __name__ == "__main__":
    # Module config: in_channels=4, out_channels=8, kernel_size=3
    N, Cin, H, W = 2, 4, 16, 16
    Cout, KS = 8, 3

    key = jax.random.PRNGKey(0)
    kx, kw = jax.random.split(key)
    x = jax.random.normal(kx, (N, Cin, H, W), dtype=jnp.float32)
    weight = 0.1 * jax.random.normal(kw, (Cout, Cin, KS, KS), dtype=jnp.float32)
    gamma = jnp.ones((Cout,), dtype=jnp.float32)   # BatchNorm2d default init
    beta = jnp.zeros((Cout,), dtype=jnp.float32)   # BatchNorm2d default init

    out = conv2d_bn_relu(x, weight, gamma, beta)
    out = jax.block_until_ready(out)

    ref = reference(x, weight, gamma, beta)
    assert out.shape == ref.shape == (N, Cout, H, W)
    # Tolerance relaxed vs the f32 reference: activations travel in bf16 and
    # the conv intermediate is stored in bf16 (f32 accumulation / stats).
    assert jnp.allclose(out, ref, rtol=3e-2, atol=3e-2), "mismatch vs reference"

    print("KERNEL_OK")
</pallas_src>

<mosaic_0001>
module attributes {stable_mosaic.version = 11 : i64} {
  func.func @conv_stats_kernel(%arg0: i32, %arg1: i32, %arg2: memref<9x8x4xf32, #tpu.memory_space<vmem>>, %arg3: memref<1x1x4x326xbf16, #tpu.memory_space<vmem>>, %arg4: memref<1x288xbf16, #tpu.memory_space<vmem>>, %arg5: memref<1x8x288xbf16, #tpu.memory_space<vmem>>, %arg6: memref<1x1x8x2xf32, #tpu.memory_space<vmem>>, %arg7: memref<8x288xf32, #tpu.memory_space<vmem>>) attributes {dimension_semantics = [#tpu.dimension_semantics<parallel>, #tpu.dimension_semantics<parallel>], iteration_bounds = array<i64: 2, 1>, scalar_prefetch = 0 : i64, scratch_operands = 1 : i64, tpu.core_type = #tpu.core_type<tc>, window_params = [{pipeline_mode = #tpu.pipeline_mode<synchronous>, transform_indices = @transform_0, window_bounds = array<i64: 9, 8, 4>}, {transform_indices = @transform_1, window_bounds = array<i64: 1, 1, 4, 326>}, {transform_indices = @transform_2, window_bounds = array<i64: 1, 288>}, {transform_indices = @transform_3, window_bounds = array<i64: 1, 8, 288>}, {transform_indices = @transform_4, window_bounds = array<i64: 1, 1, 8, 2>}]} {
    %cst = arith.constant 0.000000e+00 : f32
    %0 = vector.broadcast %cst : f32 to vector<8x288xf32>
    %c0 = arith.constant 0 : index
    %c0_0 = arith.constant 0 : index
    %1 = vector.load %arg7[%c0, %c0_0] : memref<8x288xf32, #tpu.memory_space<vmem>>, vector<8x288xf32>
    tpu.vector_store %arg7[%c0, %c0_0], %0 {strides = array<i32>} : memref<8x288xf32, #tpu.memory_space<vmem>>, vector<8x288xf32>,
    %c0_1 = arith.constant 0 : index
    %c0_2 = arith.constant 0 : index
    %c0_3 = arith.constant 0 : index
    %c0_4 = arith.constant 0 : index
    %2 = vector.load %arg3[%c0_1, %c0_2, %c0_3, %c0_4] : memref<1x1x4x326xbf16, #tpu.memory_space<vmem>>, vector<1x1x4x288xbf16>
    %3 = vector.shape_cast %2 : vector<1x1x4x288xbf16> to vector<4x288xbf16>
    %c0_5 = arith.constant 0 : index
    %c0_6 = arith.constant 0 : index
    %4 = vector.load %arg7[%c0_5, %c0_6] : memref<8x288xf32, #tpu.memory_space<vmem>>, vector<8x288xf32>
    %c0_7 = arith.constant 0 : index
    %c0_8 = arith.constant 0 : index
    %c0_9 = arith.constant 0 : index
    %5 = vector.load %arg2[%c0_7, %c0_8, %c0_9] : memref<9x8x4xf32, #tpu.memory_space<vmem>>, vector<1x8x4xf32>
    %6 = vector.shape_cast %5 : vector<1x8x4xf32> to vector<8x4xf32>
    %7 = arith.extf %3 : vector<4x288xbf16> to vector<4x288xf32>
    %cst_10 = arith.constant dense<0.000000e+00> : vector<8x288xf32>
    %8 = tpu.matmul %6, %7, %cst_10 {dimension_numbers = #tpu.dot_dimension_numbers<[1], [0], [0], [1], [0, 0, 1, 1], [], []>} : vector<8x4xf32>, vector<4x288xf32>, vector<8x288xf32> -> vector<8x288xf32>
    %9 = arith.addf %4, %8 : vector<8x288xf32>
    %c0_11 = arith.constant 0 : index
    %c0_12 = arith.constant 0 : index
    %10 = vector.load %arg7[%c0_11, %c0_12] : memref<8x288xf32, #tpu.memory_space<vmem>>, vector<8x288xf32>
    tpu.vector_store %arg7[%c0_11, %c0_12], %9 {strides = array<i32>} : memref<8x288xf32, #tpu.memory_space<vmem>>, vector<8x288xf32>,
    %c0_13 = arith.constant 0 : index
    %c0_14 = arith.constant 0 : index
    %c0_15 = arith.constant 0 : index
    %c1 = arith.constant 1 : index
    %11 = vector.load %arg3[%c0_13, %c0_14, %c0_15, %c1] : memref<1x1x4x326xbf16, #tpu.memory_space<vmem>>, vector<1x1x4x288xbf16>
    %12 = vector.shape_cast %11 : vector<1x1x4x288xbf16> to vector<4x288xbf16>
    %c0_16 = arith.constant 0 : index
    %c0_17 = arith.constant 0 : index
    %13 = vector.load %arg7[%c0_16, %c0_17] : memref<8x288xf32, #tpu.memory_space<vmem>>, vector<8x288xf32>
    %c1_18 = arith.constant 1 : index
    %c0_19 = arith.constant 0 : index
    %c0_20 = arith.constant 0 : index
    %14 = vector.load %arg2[%c1_18, %c0_19, %c0_20] : memref<9x8x4xf32, #tpu.memory_space<vmem>>, vector<1x8x4xf32>
    %15 = vector.shape_cast %14 : vector<1x8x4xf32> to vector<8x4xf32>
    %16 = arith.extf %12 : vector<4x288xbf16> to vector<4x288xf32>
    %cst_21 = arith.constant dense<0.000000e+00> : vector<8x288xf32>
    %17 = tpu.matmul %15, %16, %cst_21 {dimension_numbers = #tpu.dot_dimension_numbers<[1], [0], [0], [1], [0, 0, 1, 1], [], []>} : vector<8x4xf32>, vector<4x288xf32>, vector<8x288xf32> -> vector<8x288xf32>
    %18 = arith.addf %13, %17 : vector<8x288xf32>
    %c0_22 = arith.constant 0 : index
    %c0_23 = arith.constant 0 : index
    %19 = vector.load %arg7[%c0_22, %c0_23] : memref<8x288xf32, #tpu.memory_space<vmem>>, vector<8x288xf32>
    tpu.vector_store %arg7[%c0_22, %c0_23], %18 {strides = array<i32>} : memref<8x288xf32, #tpu.memory_space<vmem>>, vector<8x288xf32>,
    %c0_24 = arith.constant 0 : index
    %c0_25 = arith.constant 0 : index
    %c0_26 = arith.constant 0 : index
    %c2 = arith.constant 2 : index
    %20 = vector.load %arg3[%c0_24, %c0_25, %c0_26, %c2] : memref<1x1x4x326xbf16, #tpu.memory_space<vmem>>, vector<1x1x4x288xbf16>
    %21 = vector.shape_cast %20 : vector<1x1x4x288xbf16> to vector<4x288xbf16>
    %c0_27 = arith.constant 0 : index
    %c0_28 = arith.constant 0 : index
    %22 = vector.load %arg7[%c0_27, %c0_28] : memref<8x288xf32, #tpu.memory_space<vmem>>, vector<8x288xf32>
    %c2_29 = arith.constant 2 : index
    %c0_30 = arith.constant 0 : index
    %c0_31 = arith.constant 0 : index
    %23 = vector.load %arg2[%c2_29, %c0_30, %c0_31] : memref<9x8x4xf32, #tpu.memory_space<vmem>>, vector<1x8x4xf32>
    %24 = vector.shape_cast %23 : vector<1x8x4xf32> to vector<8x4xf32>
    %25 = arith.extf %21 : vector<4x288xbf16> to vector<4x288xf32>
    %cst_32 = arith.constant dense<0.000000e+00> : vector<8x288xf32>
    %26 = tpu.matmul %24, %25, %cst_32 {dimension_numbers = #tpu.dot_dimension_numbers<[1], [0], [0], [1], [0, 0, 1, 1], [], []>} : vector<8x4xf32>, vector<4x288xf32>, vector<8x288xf32> -> vector<8x288xf32>
    %27 = arith.addf %22, %26 : vector<8x288xf32>
    %c0_33 = arith.constant 0 : index
    %c0_34 = arith.constant 0 : index
    %28 = vector.load %arg7[%c0_33, %c0_34] : memref<8x288xf32, #tpu.memory_space<vmem>>, vector<8x288xf32>
    tpu.vector_store %arg7[%c0_33, %c0_34], %27 {strides = array<i32>} : memref<8x288xf32, #tpu.memory_space<vmem>>, vector<8x288xf32>,
    %c0_35 = arith.constant 0 : index
    %c0_36 = arith.constant 0 : index
    %c0_37 = arith.constant 0 : index
    %c18 = arith.constant 18 : index
    %29 = vector.load %arg3[%c0_35, %c0_36, %c0_37, %c18] : memref<1x1x4x326xbf16, #tpu.memory_space<vmem>>, vector<1x1x4x288xbf16>
    %30 = vector.shape_cast %29 : vector<1x1x4x288xbf16> to vector<4x288xbf16>
    %c0_38 = arith.constant 0 : index
    %c0_39 = arith.constant 0 : index
    %31 = vector.load %arg7[%c0_38, %c0_39] : memref<8x288xf32, #tpu.memory_space<vmem>>, vector<8x288xf32>
    %c3 = arith.constant 3 : index
    %c0_40 = arith.constant 0 : index
    %c0_41 = arith.constant 0 : index
    %32 = vector.load %arg2[%c3, %c0_40, %c0_41] : memref<9x8x4xf32, #tpu.memory_space<vmem>>, vector<1x8x4xf32>
    %33 = vector.shape_cast %32 : vector<1x8x4xf32> to vector<8x4xf32>
    %34 = arith.extf %30 : vector<4x288xbf16> to vector<4x288xf32>
    %cst_42 = arith.constant dense<0.000000e+00> : vector<8x288xf32>
    %35 = tpu.matmul %33, %34, %cst_42 {dimension_numbers = #tpu.dot_dimension_numbers<[1], [0], [0], [1], [0, 0, 1, 1], [], []>} : vector<8x4xf32>, vector<4x288xf32>, vector<8x288xf32> -> vector<8x288xf32>
    %36 = arith.addf %31, %35 : vector<8x288xf32>
    %c0_43 = arith.constant 0 : index
    %c0_44 = arith.constant 0 : index
    %37 = vector.load %arg7[%c0_43, %c0_44] : memref<8x288xf32, #tpu.memory_space<vmem>>, vector<8x288xf32>
    tpu.vector_store %arg7[%c0_43, %c0_44], %36 {strides = array<i32>} : memref<8x288xf32, #tpu.memory_space<vmem>>, vector<8x288xf32>,
    %c0_45 = arith.constant 0 : index
    %c0_46 = arith.constant 0 : index
    %c0_47 = arith.constant 0 : index
    %c19 = arith.constant 19 : index
    %38 = vector.load %arg3[%c0_45, %c0_46, %c0_47, %c19] : memref<1x1x4x326xbf16, #tpu.memory_space<vmem>>, vector<1x1x4x288xbf16>
    %39 = vector.shape_cast %38 : vector<1x1x4x288xbf16> to vector<4x288xbf16>
    %c0_48 = arith.constant 0 : index
    %c0_49 = arith.constant 0 : index
    %40 = vector.load %arg7[%c0_48, %c0_49] : memref<8x288xf32, #tpu.memory_space<vmem>>, vector<8x288xf32>
    %c4 = arith.constant 4 : index
    %c0_50 = arith.constant 0 : index
    %c0_51 = arith.constant 0 : index
    %41 = vector.load %arg2[%c4, %c0_50, %c0_51] : memref<9x8x4xf32, #tpu.memory_space<vmem>>, vector<1x8x4xf32>
    %42 = vector.shape_cast %41 : vector<1x8x4xf32> to vector<8x4xf32>
    %43 = arith.extf %39 : vector<4x288xbf16> to vector<4x288xf32>
    %cst_52 = arith.constant dense<0.000000e+00> : vector<8x288xf32>
    %44 = tpu.matmul %42, %43, %cst_52 {dimension_numbers = #tpu.dot_dimension_numbers<[1], [0], [0], [1], [0, 0, 1, 1], [], []>} : vector<8x4xf32>, vector<4x288xf32>, vector<8x288xf32> -> vector<8x288xf32>
    %45 = arith.addf %40, %44 : vector<8x288xf32>
    %c0_53 = arith.constant 0 : index
    %c0_54 = arith.constant 0 : index
    %46 = vector.load %arg7[%c0_53, %c0_54] : memref<8x288xf32, #tpu.memory_space<vmem>>, vector<8x288xf32>
    tpu.vector_store %arg7[%c0_53, %c0_54], %45 {strides = array<i32>} : memref<8x288xf32, #tpu.memory_space<vmem>>, vector<8x288xf32>,
    %c0_55 = arith.constant 0 : index
    %c0_56 = arith.constant 0 : index
    %c0_57 = arith.constant 0 : index
    %c20 = arith.constant 20 : index
    %47 = vector.load %arg3[%c0_55, %c0_56, %c0_57, %c20] : memref<1x1x4x326xbf16, #tpu.memory_space<vmem>>, vector<1x1x4x288xbf16>
    %48 = vector.shape_cast %47 : vector<1x1x4x288xbf16> to vector<4x288xbf16>
    %c0_58 = arith.constant 0 : index
    %c0_59 = arith.constant 0 : index
    %49 = vector.load %arg7[%c0_58, %c0_59] : memref<8x288xf32, #tpu.memory_space<vmem>>, vector<8x288xf32>
    %c5 = arith.constant 5 : index
    %c0_60 = arith.constant 0 : index
    %c0_61 = arith.constant 0 : index
    %50 = vector.load %arg2[%c5, %c0_60, %c0_61] : memref<9x8x4xf32, #tpu.memory_space<vmem>>, vector<1x8x4xf32>
    %51 = vector.shape_cast %50 : vector<1x8x4xf32> to vector<8x4xf32>
    %52 = arith.extf %48 : vector<4x288xbf16> to vector<4x288xf32>
    %cst_62 = arith.constant dense<0.000000e+00> : vector<8x288xf32>
    %53 = tpu.matmul %51, %52, %cst_62 {dimension_numbers = #tpu.dot_dimension_numbers<[1], [0], [0], [1], [0, 0, 1, 1], [], []>} : vector<8x4xf32>, vector<4x288xf32>, vector<8x288xf32> -> vector<8x288xf32>
    %54 = arith.addf %49, %53 : vector<8x288xf32>
    %c0_63 = arith.constant 0 : index
    %c0_64 = arith.constant 0 : index
    %55 = vector.load %arg7[%c0_63, %c0_64] : memref<8x288xf32, #tpu.memory_space<vmem>>, vector<8x288xf32>
    tpu.vector_store %arg7[%c0_63, %c0_64], %54 {strides = array<i32>} : memref<8x288xf32, #tpu.memory_space<vmem>>, vector<8x288xf32>,
    %c0_65 = arith.constant 0 : index
    %c0_66 = arith.constant 0 : index
    %c0_67 = arith.constant 0 : index
    %c36 = arith.constant 36 : index
    %56 = vector.load %arg3[%c0_65, %c0_66, %c0_67, %c36] : memref<1x1x4x326xbf16, #tpu.memory_space<vmem>>, vector<1x1x4x288xbf16>
    %57 = vector.shape_cast %56 : vector<1x1x4x288xbf16> to vector<4x288xbf16>
    %c0_68 = arith.constant 0 : index
    %c0_69 = arith.constant 0 : index
    %58 = vector.load %arg7[%c0_68, %c0_69] : memref<8x288xf32, #tpu.memory_space<vmem>>, vector<8x288xf32>
    %c6 = arith.constant 6 : index
    %c0_70 = arith.constant 0 : index
    %c0_71 = arith.constant 0 : index
    %59 = vector.load %arg2[%c6, %c0_70, %c0_71] : memref<9x8x4xf32, #tpu.memory_space<vmem>>, vector<1x8x4xf32>
    %60 = vector.shape_cast %59 : vector<1x8x4xf32> to vector<8x4xf32>
    %61 = arith.extf %57 : vector<4x288xbf16> to vector<4x288xf32>
    %cst_72 = arith.constant dense<0.000000e+00> : vector<8x288xf32>
    %62 = tpu.matmul %60, %61, %cst_72 {dimension_numbers = #tpu.dot_dimension_numbers<[1], [0], [0], [1], [0, 0, 1, 1], [], []>} : vector<8x4xf32>, vector<4x288xf32>, vector<8x288xf32> -> vector<8x288xf32>
    %63 = arith.addf %58, %62 : vector<8x288xf32>
    %c0_73 = arith.constant 0 : index
    %c0_74 = arith.constant 0 : index
    %64 = vector.load %arg7[%c0_73, %c0_74] : memref<8x288xf32, #tpu.memory_space<vmem>>, vector<8x288xf32>
    tpu.vector_store %arg7[%c0_73, %c0_74], %63 {strides = array<i32>} : memref<8x288xf32, #tpu.memory_space<vmem>>, vector<8x288xf32>,
    %c0_75 = arith.constant 0 : index
    %c0_76 = arith.constant 0 : index
    %c0_77 = arith.constant 0 : index
    %c37 = arith.constant 37 : index
    %65 = vector.load %arg3[%c0_75, %c0_76, %c0_77, %c37] : memref<1x1x4x326xbf16, #tpu.memory_space<vmem>>, vector<1x1x4x288xbf16>
    %66 = vector.shape_cast %65 : vector<1x1x4x288xbf16> to vector<4x288xbf16>
    %c0_78 = arith.constant 0 : index
    %c0_79 = arith.constant 0 : index
    %67 = vector.load %arg7[%c0_78, %c0_79] : memref<8x288xf32, #tpu.memory_space<vmem>>, vector<8x288xf32>
    %c7 = arith.constant 7 : index
    %c0_80 = arith.constant 0 : index
    %c0_81 = arith.constant 0 : index
    %68 = vector.load %arg2[%c7, %c0_80, %c0_81] : memref<9x8x4xf32, #tpu.memory_space<vmem>>, vector<1x8x4xf32>
    %69 = vector.shape_cast %68 : vector<1x8x4xf32> to vector<8x4xf32>
    %70 = arith.extf %66 : vector<4x288xbf16> to vector<4x288xf32>
    %cst_82 = arith.constant dense<0.000000e+00> : vector<8x288xf32>
    %71 = tpu.matmul %69, %70, %cst_82 {dimension_numbers = #tpu.dot_dimension_numbers<[1], [0], [0], [1], [0, 0, 1, 1], [], []>} : vector<8x4xf32>, vector<4x288xf32>, vector<8x288xf32> -> vector<8x288xf32>
    %72 = arith.addf %67, %71 : vector<8x288xf32>
    %c0_83 = arith.constant 0 : index
    %c0_84 = arith.constant 0 : index
    %73 = vector.load %arg7[%c0_83, %c0_84] : memref<8x288xf32, #tpu.memory_space<vmem>>, vector<8x288xf32>
    tpu.vector_store %arg7[%c0_83, %c0_84], %72 {strides = array<i32>} : memref<8x288xf32, #tpu.memory_space<vmem>>, vector<8x288xf32>,
    %c0_85 = arith.constant 0 : index
    %c0_86 = arith.constant 0 : index
    %c0_87 = arith.constant 0 : index
    %c38 = arith.constant 38 : index
    %74 = vector.load %arg3[%c0_85, %c0_86, %c0_87, %c38] : memref<1x1x4x326xbf16, #tpu.memory_space<vmem>>, vector<1x1x4x288xbf16>
    %75 = vector.shape_cast %74 : vector<1x1x4x288xbf16> to vector<4x288xbf16>
    %c0_88 = arith.constant 0 : index
    %c0_89 = arith.constant 0 : index
    %76 = vector.load %arg7[%c0_88, %c0_89] : memref<8x288xf32, #tpu.memory_space<vmem>>, vector<8x288xf32>
    %c8 = arith.constant 8 : index
    %c0_90 = arith.constant 0 : index
    %c0_91 = arith.constant 0 : index
    %77 = vector.load %arg2[%c8, %c0_90, %c0_91] : memref<9x8x4xf32, #tpu.memory_space<vmem>>, vector<1x8x4xf32>
    %78 = vector.shape_cast %77 : vector<1x8x4xf32> to vector<8x4xf32>
    %79 = arith.extf %75 : vector<4x288xbf16> to vector<4x288xf32>
    %cst_92 = arith.constant dense<0.000000e+00> : vector<8x288xf32>
    %80 = tpu.matmul %78, %79, %cst_92 {dimension_numbers = #tpu.dot_dimension_numbers<[1], [0], [0], [1], [0, 0, 1, 1], [], []>} : vector<8x4xf32>, vector<4x288xf32>, vector<8x288xf32> -> vector<8x288xf32>
    %81 = arith.addf %76, %80 : vector<8x288xf32>
    %c0_93 = arith.constant 0 : index
    %c0_94 = arith.constant 0 : index
    %82 = vector.load %arg7[%c0_93, %c0_94] : memref<8x288xf32, #tpu.memory_space<vmem>>, vector<8x288xf32>
    tpu.vector_store %arg7[%c0_93, %c0_94], %81 {strides = array<i32>} : memref<8x288xf32, #tpu.memory_space<vmem>>, vector<8x288xf32>,
    %c0_95 = arith.constant 0 : index
    %c0_96 = arith.constant 0 : index
    %83 = vector.load %arg7[%c0_95, %c0_96] : memref<8x288xf32, #tpu.memory_space<vmem>>, vector<8x288xf32>
    %84 = arith.truncf %83 : vector<8x288xf32> to vector<8x288xbf16>
    %85 = vector.shape_cast %84 : vector<8x288xbf16> to vector<1x8x288xbf16>
    %c0_97 = arith.constant 0 : index
    %c0_98 = arith.constant 0 : index
    %c0_99 = arith.constant 0 : index
    %86 = vector.load %arg5[%c0_97, %c0_98, %c0_99] : memref<1x8x288xbf16, #tpu.memory_space<vmem>>, vector<1x8x288xbf16>
    tpu.vector_store %arg5[%c0_97, %c0_98, %c0_99], %85 {strides = array<i32>} : memref<1x8x288xbf16, #tpu.memory_space<vmem>>, vector<1x8x288xbf16>,
    %c0_100 = arith.constant 0 : index
    %c0_101 = arith.constant 0 : index
    %87 = vector.load %arg4[%c0_100, %c0_101] : memref<1x288xbf16, #tpu.memory_space<vmem>>, vector<1x288xbf16>
    %88 = arith.extf %87 : vector<1x288xbf16> to vector<1x288xf32>
    %89 = vector.broadcast %88 : vector<1x288xf32> to vector<8x288xf32>
    %90 = arith.mulf %83, %89 : vector<8x288xf32>
    %cst_102 = arith.constant dense<0.000000e+00> : vector<8xf32>
    %91 = vector.multi_reduction <add>, %90, %cst_102 [1] : vector<8x288xf32> to vector<8xf32>
    %92 = vector.shape_cast %91 : vector<8xf32> to vector<8x1xf32>
    %c0_103 = arith.constant 0 : index
    %c0_104 = arith.constant 0 : index
    %c0_105 = arith.constant 0 : index
    %c0_106 = arith.constant 0 : index
    %93 = vector.load %arg6[%c0_103, %c0_104, %c0_105, %c0_106] : memref<1x1x8x2xf32, #tpu.memory_space<vmem>>, vector<1x1x8x1xf32>
    %94 = vector.shape_cast %93 : vector<1x1x8x1xf32> to vector<8x1xf32>
    %95 = vector.shape_cast %92 : vector<8x1xf32> to vector<1x1x8x1xf32>
    tpu.vector_store %arg6[%c0_103, %c0_104, %c0_105, %c0_106], %95 {strides = array<i32>} : memref<1x1x8x2xf32, #tpu.memory_space<vmem>>, vector<1x1x8x1xf32>,
    %96 = arith.mulf %90, %83 : vector<8x288xf32>
    %cst_107 = arith.constant dense<0.000000e+00> : vector<8xf32>
    %97 = vector.multi_reduction <add>, %96, %cst_107 [1] : vector<8x288xf32> to vector<8xf32>
    %98 = vector.shape_cast %97 : vector<8xf32> to vector<8x1xf32>
    %c0_108 = arith.constant 0 : index
    %c0_109 = arith.constant 0 : index
    %c0_110 = arith.constant 0 : index
    %c1_111 = arith.constant 1 : index
    %99 = vector.load %arg6[%c0_108, %c0_109, %c0_110, %c1_111] : memref<1x1x8x2xf32, #tpu.memory_space<vmem>>, vector<1x1x8x1xf32>
    %100 = vector.shape_cast %99 : vector<1x1x8x1xf32> to vector<8x1xf32>
    %101 = vector.shape_cast %98 : vector<8x1xf32> to vector<1x1x8x1xf32>
    tpu.vector_store %arg6[%c0_108, %c0_109, %c0_110, %c1_111], %101 {strides = array<i32>} : memref<1x1x8x2xf32, #tpu.memory_space<vmem>>, vector<1x1x8x1xf32>,
    return
  }
  func.func @transform_0(%arg0: i32, %arg1: i32) -> (i32, i32, i32) {
    %c0_i32 = arith.constant 0 : i32
    %c0_i32_0 = arith.constant 0 : i32
    %c0_i32_1 = arith.constant 0 : i32
    %c0_i32_2 = arith.constant 0 : i32
    return %c0_i32, %c0_i32_0, %c0_i32_1 : i32, i32, i32
  }
  func.func @transform_1(%arg0: i32, %arg1: i32) -> (i32, i32, i32, i32) {
    %c0_i32 = arith.constant 0 : i32
    %c0_i32_0 = arith.constant 0 : i32
    %c0_i32_1 = arith.constant 0 : i32
    return %arg0, %arg1, %c0_i32, %c0_i32_0 : i32, i32, i32, i32
  }
  func.func @transform_2(%arg0: i32, %arg1: i32) -> (i32, i32) {
    %c0_i32 = arith.constant 0 : i32
    %c0_i32_0 = arith.constant 0 : i32
    return %c0_i32, %arg1 : i32, i32
  }
  func.func @transform_3(%arg0: i32, %arg1: i32) -> (i32, i32, i32) {
    %c0_i32 = arith.constant 0 : i32
    %c0_i32_0 = arith.constant 0 : i32
    return %arg0, %c0_i32, %arg1 : i32, i32, i32
  }
  func.func @transform_4(%arg0: i32, %arg1: i32) -> (i32, i32, i32, i32) {
    %c0_i32 = arith.constant 0 : i32
    %c0_i32_0 = arith.constant 0 : i32
    %c0_i32_1 = arith.constant 0 : i32
    return %arg0, %arg1, %c0_i32, %c0_i32_0 : i32, i32, i32, i32
  }
}

module attributes {stable_mosaic.version = 11 : i64} {
  func.func @bn_relu_kernel(%arg0: i32, %arg1: i32, %arg2: memref<1x8x16x18xbf16, #tpu.memory_space<vmem>>, %arg3: memref<1x8x1x1xf32, #tpu.memory_space<vmem>>, %arg4: memref<1x8x1x1xf32, #tpu.memory_space<vmem>>, %arg5: memref<1x8x16x16xf32, #tpu.memory_space<vmem>>) attributes {dimension_semantics = [#tpu.dimension_semantics<parallel>, #tpu.dimension_semantics<parallel>], iteration_bounds = array<i64: 2, 1>, scalar_prefetch = 0 : i64, scratch_operands = 0 : i64, tpu.core_type = #tpu.core_type<tc>, window_params = [{transform_indices = @transform_0, window_bounds = array<i64: 1, 8, 16, 18>}, {pipeline_mode = #tpu.pipeline_mode<synchronous>, transform_indices = @transform_1, window_bounds = array<i64: 1, 8, 1, 1>}, {pipeline_mode = #tpu.pipeline_mode<synchronous>, transform_indices = @transform_2, window_bounds = array<i64: 1, 8, 1, 1>}, {transform_indices = @transform_3, window_bounds = array<i64: 1, 8, 16, 16>}]} {
    %c0 = arith.constant 0 : index
    %c0_0 = arith.constant 0 : index
    %c0_1 = arith.constant 0 : index
    %c0_2 = arith.constant 0 : index
    %0 = vector.load %arg2[%c0, %c0_0, %c0_1, %c0_2] : memref<1x8x16x18xbf16, #tpu.memory_space<vmem>>, vector<1x8x16x16xbf16>
    %1 = arith.extf %0 : vector<1x8x16x16xbf16> to vector<1x8x16x16xf32>
    %c0_3 = arith.constant 0 : index
    %c0_4 = arith.constant 0 : index
    %c0_5 = arith.constant 0 : index
    %c0_6 = arith.constant 0 : index
    %2 = vector.load %arg3[%c0_3, %c0_4, %c0_5, %c0_6] : memref<1x8x1x1xf32, #tpu.memory_space<vmem>>, vector<1x8x1x1xf32>
    %3 = vector.broadcast %2 : vector<1x8x1x1xf32> to vector<1x8x16x16xf32>
    %4 = arith.mulf %1, %3 : vector<1x8x16x16xf32>
    %c0_7 = arith.constant 0 : index
    %c0_8 = arith.constant 0 : index
    %c0_9 = arith.constant 0 : index
    %c0_10 = arith.constant 0 : index
    %5 = vector.load %arg4[%c0_7, %c0_8, %c0_9, %c0_10] : memref<1x8x1x1xf32, #tpu.memory_space<vmem>>, vector<1x8x1x1xf32>
    %6 = vector.broadcast %5 : vector<1x8x1x1xf32> to vector<1x8x16x16xf32>
    %7 = arith.addf %4, %6 : vector<1x8x16x16xf32>
    %cst = arith.constant 0.000000e+00 : f32
    %8 = vector.broadcast %cst : f32 to vector<1x8x16x16xf32>
    %9 = arith.maximumf %7, %8 : vector<1x8x16x16xf32>
    %c0_11 = arith.constant 0 : index
    %c0_12 = arith.constant 0 : index
    %c0_13 = arith.constant 0 : index
    %c0_14 = arith.constant 0 : index
    %10 = vector.load %arg5[%c0_11, %c0_12, %c0_13, %c0_14] : memref<1x8x16x16xf32, #tpu.memory_space<vmem>>, vector<1x8x16x16xf32>
    tpu.vector_store %arg5[%c0_11, %c0_12, %c0_13, %c0_14], %9 {strides = array<i32>} : memref<1x8x16x16xf32, #tpu.memory_space<vmem>>, vector<1x8x16x16xf32>,
    return
  }
  func.func @transform_0(%arg0: i32, %arg1: i32) -> (i32, i32, i32, i32) {
    %c0_i32 = arith.constant 0 : i32
    %c0_i32_0 = arith.constant 0 : i32
    %c0_i32_1 = arith.constant 0 : i32
    return %arg0, %c0_i32, %arg1, %c0_i32_0 : i32, i32, i32, i32
  }
  func.func @transform_1(%arg0: i32, %arg1: i32) -> (i32, i32, i32, i32) {
    %c0_i32 = arith.constant 0 : i32
    %c0_i32_0 = arith.constant 0 : i32
    %c0_i32_1 = arith.constant 0 : i32
    %c0_i32_2 = arith.constant 0 : i32
    %c0_i32_3 = arith.constant 0 : i32
    return %c0_i32, %c0_i32_0, %c0_i32_1, %c0_i32_2 : i32, i32, i32, i32
  }
  func.func @transform_2(%arg0: i32, %arg1: i32) -> (i32, i32, i32, i32) {
    %c0_i32 = arith.constant 0 : i32
    %c0_i32_0 = arith.constant 0 : i32
    %c0_i32_1 = arith.constant 0 : i32
    %c0_i32_2 = arith.constant 0 : i32
    %c0_i32_3 = arith.constant 0 : i32
    return %c0_i32, %c0_i32_0, %c0_i32_1, %c0_i32_2 : i32, i32, i32, i32
  }
  func.func @transform_3(%arg0: i32, %arg1: i32) -> (i32, i32, i32, i32) {
    %c0_i32 = arith.constant 0 : i32
    %c0_i32_0 = arith.constant 0 : i32
    %c0_i32_1 = arith.constant 0 : i32
    return %arg0, %c0_i32, %arg1, %c0_i32_0 : i32, i32, i32, i32
  }
}

</mosaic_0001>

<bundles_post_ra>
// kernel: conv2d_bn_relu.3
= control target key start
LH: loop header
LB: loop body
LE: loop exit
PB: predicated region body
PF: predicated region fallthrough
CT: control target
= control target key end

     0   :  { %8 = vsyncpa [#allocation3], 0  ;;  %s1006_s0 = inlined_call_operand.vmem [shape: bf16[2,8,16,18], index: 0, kind: input, shape index: {}]   ;;  %s1007_s1 = inlined_call_operand.vmem [shape: f32[1,8,1,1], index: 1, kind: input, shape index: {}]   ;;  %s1008_s2 = inlined_call_operand.vmem [shape: f32[1,8,1,1], index: 2, kind: input, shape index: {}]   ;;  %s1009_s3 = inlined_call_operand.hbm [shape: f32[2,8,16,16], index: 3, kind: output, shape index: {}]  }
   0x1   :  { %10 = vsyncpa [#allocation3 + $0x1], 0  ;;  %s786_s12 = smov 0   ;;  %s788_s13 = smov 0  }
   0x2   :  { %s790_s14 = smov 0   ;;  %s792_s15 = smov 0  }
   0x3   :  { %s794_s16 = smov 0   ;;  %s796_s17 = smov 0  }
   0x4 LB: > { %s552_s18 = sadd.s32 4294967295, %s760_s17   ;;  %s553_s19 = sadd.s32 4294967294, %s760_s17   ;;  %s760_s17 = sphi %s796_s17, %s16_s17   ;;  %s756_s16 = sphi %s794_s16, %s1016_s16   ;;  %s752_s15 = sphi %s792_s15, %s1015_s15   ;;  %s748_s14 = sphi %s790_s14, %s1014_s14   ;;  %s744_s13 = sphi %s788_s13, %s1013_s13   ;;  %s740_s12 = sphi %s786_s12, %s1012_s12  }
   0x5   : > { %s28_s20 = sadd.s32 1, %s756_s16  ;;  %s107_s21 = sadd.s32 1, %s748_s14 }
   0x6   : > { %p30_p0 = scmp.ge.s32.totalorder %s28_s20, 2  ;;  %p117_p1 = scmp.ne.s32.totalorder %s748_s14, %s744_s13 }
   0x7   : > { %p118_p2 = scmp.eq.s32.totalorder %s552_s18, 1  ;;  %p123_p3 = scmp.ne.s32.totalorder %s744_s13, %s740_s12 }
   0x8   : > { %s1018_s20 = smov (%p30_p0, %s28_s20), 0  ;;  %p124_p5 = scmp.eq.s32.totalorder %s553_s19, 1 }
   0x9   : > { %p826_p4 = por %p118_p2, %p117_p1  ;;  %s102_s23 = ssub.s32 %s756_s16, %s1018_s20 }
   0xa   : > { %p556_p6 = scmp.ge.s32.totalorder %s760_s17, 1  ;;  %p105_p7 = scmp.eq.s32.totalorder %s102_s23, 0 }
   0xb   : > { %p833_p8 = por %p124_p5, %p123_p3  ;;  %p161_p9 = scmp.lt.s32.totalorder %s760_s17, 3 }
   0xc   : > { %s839_s25 = scalar_select %p105_p7, %s748_s14, %s107_s21  }
   0xd   : > { %p162_p10 = pnand %p556_p6, %p161_p9 }
   0xe   : > { %v562_v0 = vld [vmem:[%s1007_s1 + $0x2] ss:$0 sm:$0xff] (!%p162_p10)  ;;  %v560_v1 = vld [vmem:[%s1007_s1] ss:$0 sm:$0xff] (!%p162_p10)  ;;  %v762_v2 = vmov (!%p162_p10), 0   ;;  %p190_p11 = scmp.lt.s32.totalorder (!%p162_p10), %s752_s15, 1 }
   0xf   : > { %165 = sbr.rel (%p162_p10) target bundleno = 192 (0xc0), region = 32  ;;  %681 = vset.pattern.permute.xlu1 (!%p162_p10), %v762_v2  ;;  %680 = vset.pattern.permute.xlu0 (!%p162_p10), %v762_v2  ;;  %v563_v3 = vld [vmem:[%s1007_s1 + $0x3] ss:$0 sm:$0xff] (!%p162_p10)  ;;  %v561_v4 = vld [vmem:[%s1007_s1 + $0x1] ss:$0 sm:$0xff] (!%p162_p10)  ;;  %s186_s29 = sand.u32 (!%p162_p10), 1, %s744_s13  }
  0x10   : > { %289 = vperm.xlu1 (!%p162_p10), %681, %v562_v0   ;;  %281 = vperm.xlu0 (!%p162_p10), %680, %v560_v1   ;;  %v565_v5 = vld [vmem:[%s1007_s1 + $0x5] ss:$0 sm:$0xff] (!%p162_p10)  ;;  %v564_v6 = vld [vmem:[%s1007_s1 + $0x4] ss:$0 sm:$0xff] (!%p162_p10)  ;;  %v567_v7 = vld [vmem:[%s1007_s1 + $0x7] ss:$0 sm:$0xff] (!%p162_p10) }
  0x11   : > { %v566_v8 = vld [vmem:[%s1007_s1 + $0x6] ss:$0 sm:$0xff] (!%p162_p10)  ;;  %v569_v9 = vld [vmem:[%s1008_s2 + $0x1] ss:$0 sm:$0xff] (!%p162_p10)  ;;  %v568_v10 = vld [vmem:[%s1008_s2] ss:$0 sm:$0xff] (!%p162_p10) }
  0x12   : > { %v571_v11 = vld [vmem:[%s1008_s2 + $0x3] ss:$0 sm:$0xff] (!%p162_p10)  ;;  %v570_v12 = vld [vmem:[%s1008_s2 + $0x2] ss:$0 sm:$0xff] (!%p162_p10)  ;;  %v573_v13 = vld [vmem:[%s1008_s2 + $0x5] ss:$0 sm:$0xff] (!%p162_p10) }
  0x13   : > { %v572_v14 = vld [vmem:[%s1008_s2 + $0x4] ss:$0 sm:$0xff] (!%p162_p10)  ;;  %v575_v15 = vld [vmem:[%s1008_s2 + $0x7] ss:$0 sm:$0xff] (!%p162_p10)  ;;  %v574_v16 = vld [vmem:[%s1008_s2 + $0x6] ss:$0 sm:$0xff] (!%p162_p10) }
  0x14   : > { %293 = vperm.xlu1 (!%p162_p10), %681, %v563_v3   ;;  %285 = vperm.xlu0 (!%p162_p10), %680, %v561_v4   ;;  %s557_s30 = sshll.u32 (!%p162_p10), %s186_s29, 7  ;;  %vm440_vm0 = vcmask (!%p162_p10), 130048   ;;  %s582_s5 = sshll.u32 (!%p162_p10), %s752_s15, 11 }
  0x15   : > { %s911_s4 = scalar_lea.vmem (!%p162_p10), [#allocation2], %s557_s30  ;;  %s946_s8 = scalar_lea.hbm (!%p162_p10), %s1009_s3, %s582_s5 }
  0x16   : > { %s191_s21 = scalar_select %p190_p11, %s752_s15, 1 }
  0x17   : > { %s473_s6 = sshll.u32 %s911_s4, 4  ;;  %s960_s9 = scalar_lea.sflag [#allocation3], %s186_s29  ;;  %s948_s6 = int_to_ptr.vmem [resolvable:$true] %s473_s6 }
  0x18   : > { %301 = vperm.xlu1 %681, %v565_v5   ;;  %297 = vperm.xlu0 %680, %v564_v6   ;;  %s581_s23 = sshll.u32 %s191_s21, 6  ;;  %s682_s10 = scalar_lea.vmem %s948_s6, 2048 }
  0x19   : > { %s894_s28 = scalar_lea.vmem %s1006_s0, %s581_s23  ;;  %p683_p12 = scmp.ne.s32.totalorder %s948_s6, %s682_s10 }
  0x1a   : > { %v584_v21 = vld [vmem:[%s894_s28] sm:$0xff]   ;;  %v615_v22 = vld [vmem:[%s894_s28 + $0x8] sm:$0xff]   ;;  %v616_v25 = vld [vmem:[%s894_s28 + $0x10] sm:$0xff]   ;;  %s763_s11 = smov [#allocation2]  }
  0x1b   : > { %v585_v26 = vunpack.c.l.bf16 %v584_v21  ;;  %v586_v27 = vunpack.c.h.bf16 %v584_v21  ;;  %v617_v28 = vld [vmem:[%s894_s28 + $0x18] sm:$0xff]   ;;  %v589_v29 = vunpack.c.l.bf16 %v615_v22  ;;  %v590_v30 = vunpack.c.h.bf16 %v615_v22  ;;  %v619_v31 = vld [vmem:[%s894_s28 + $0x28] sm:$0xff]   ;;  %v618_v35 = vld [vmem:[%s894_s28 + $0x20] sm:$0xff]   ;;  %p684_p13 = pnand %p683_p12, %p826_p4  ;;  %s686_s18 = sshll.u32 %s763_s11, 4  ;;  %s687_s18 = int_to_ptr.vmem [resolvable:$false] %s686_s18 }
  0x1c   : > { %309 = vperm.xlu1 %681, %v567_v7   ;;  %305 = vperm.xlu0 %680, %v566_v8   ;;  %v593_v34 = vunpack.c.l.bf16 %v616_v25  ;;  %v594_v36 = vunpack.c.h.bf16 %v616_v25  ;;  %v597_v37 = vunpack.c.l.bf16 %v617_v28  ;;  %v598_v38 = vunpack.c.h.bf16 %v617_v28  ;;  %v621_v49 = vld [vmem:[%s894_s28 + $0x38] sm:$0xff]   ;;  %v620_v50 = vld [vmem:[%s894_s28 + $0x30] sm:$0xff]   ;;  %s688_s19 = scalar_lea.vmem %s687_s18, 4096  ;;  %p689_p1 = scmp.lt.s32.totalorder %s948_s6, %s687_s18 }
  0x1d   : > { %v605_v39 = vunpack.c.l.bf16 %v619_v31  ;;  %v606_v44 = vunpack.c.h.bf16 %v619_v31  ;;  %v601_v45 = vunpack.c.l.bf16 %v618_v35  ;;  %v602_v46 = vunpack.c.h.bf16 %v618_v35  ;;  %p685_p0 = pneg %p684_p13  ;;  %p690_p2 = scmp.lt.s32.totalorder %s688_s19, %s682_s10 }
  0x1e   : > { %v613_v63 = vunpack.c.l.bf16 %v621_v49  ;;  %v614_v0 = vunpack.c.h.bf16 %v621_v49  ;;  %v609_v1 = vunpack.c.l.bf16 %v620_v50  ;;  %v610_v2 = vunpack.c.h.bf16 %v620_v50 }
  0x1f   : > { %p691_p3 = por %p690_p2, %p689_p1 }
  0x20   : > { %381 = vperm.xlu1 %681, %v569_v9   ;;  %377 = vperm.xlu0 %680, %v568_v10  }
  0x21   : > { %p692_p5 = pnand %p691_p3, %p685_p0 }
  0x24   : > { %389 = vperm.xlu1 %681, %v571_v11   ;;  %385 = vperm.xlu0 %680, %v570_v12  }
  0x28   : > { %397 = vperm.xlu1 %681, %v573_v13   ;;  %393 = vperm.xlu0 %680, %v572_v14  }
  0x2c   : > { %405 = vperm.xlu1 %681, %v575_v15   ;;  %401 = vperm.xlu0 %680, %v574_v16  }
  0x8f   : > { %v290_v17 = vpop.permute.xlu1 %289  ;;  %v282_v18 = vpop.permute.xlu0 %281 }
  0x90   : > { %v312_v40 = vmul.f32 %v585_v26, %v282_v18  ;;  %v313_v41 = vmul.f32 %v586_v27, %v282_v18  ;;  %v316_v55 = vmul.f32 %v593_v34, %v290_v17  ;;  %v317_v56 = vmul.f32 %v594_v36, %v290_v17 }
  0x93   : > { %v294_v19 = vpop.permute.xlu1 %293  ;;  %v286_v20 = vpop.permute.xlu0 %285 }
  0x94   : > { %v314_v42 = vmul.f32 %v589_v29, %v286_v20  ;;  %v315_v43 = vmul.f32 %v590_v30, %v286_v20  ;;  %v318_v57 = vmul.f32 %v597_v37, %v294_v19  ;;  %v319_v58 = vmul.f32 %v598_v38, %v294_v19 }
  0x97   : > { %v302_v23 = vpop.permute.xlu1 %301  ;;  %v298_v24 = vpop.permute.xlu0 %297 }
  0x98   : > { %v322_v9 = vmul.f32 %v605_v39, %v302_v23  ;;  %v323_v10 = vmul.f32 %v606_v44, %v302_v23  ;;  %v320_v11 = vmul.f32 %v601_v45, %v298_v24  ;;  %v321_v12 = vmul.f32 %v602_v46, %v298_v24 }
  0x9b   : > { %v901_v32 = vpop.permute.xlu1 %309  ;;  %v903_v33 = vpop.permute.xlu0 %305 }
  0x9c   : > { %v326_v23 = vmul.f32 %v613_v63, %v901_v32  ;;  %v327_v24 = vmul.f32 %v614_v0, %v901_v32  ;;  %v324_v25 = vmul.f32 %v609_v1, %v903_v33  ;;  %v325_v26 = vmul.f32 %v610_v2, %v903_v33 }
  0x9f   : > { %v382_v47 = vpop.permute.xlu1 %381  ;;  %v378_v48 = vpop.permute.xlu0 %377 }
  0xa0   : > { %v410_v51 = vadd.f32 %v382_v47, %v314_v42  ;;  %v411_v52 = vadd.f32 %v382_v47, %v315_v43  ;;  %v408_v53 = vadd.f32 %v378_v48, %v312_v40  ;;  %v409_v54 = vadd.f32 %v378_v48, %v313_v41 }
  0xa2   : > { %v426_v59 = vmax.f32 %v410_v51, 0.0  ;;  %v427_v60 = vmax.f32 %v411_v52, 0.0  ;;  %v424_v61 = vmax.f32 %v408_v53, 0.0  ;;  %v425_v62 = vmax.f32 %v409_v54, 0.0 }
  0xa3   : > { %v390_v3 = vpop.permute.xlu1 %389  ;;  %v386_v4 = vpop.permute.xlu0 %385 }
  0xa4   : > { %443 = vst.msk [vmem:[%s911_s4 + $0x10] sm:$0xff] %vm440_vm0, %v426_v59  ;;  %444 = vst.msk [vmem:[%s911_s4 + $0x18] sm:$0xff] %vm440_vm0, %v427_v60  ;;  %v414_v5 = vadd.f32 %v390_v3, %v318_v57  ;;  %v415_v6 = vadd.f32 %v390_v3, %v319_v58  ;;  %v412_v7 = vadd.f32 %v386_v4, %v316_v55 }
  0xa5   : > { %441 = vst.msk [vmem:[%s911_s4] sm:$0xff] %vm440_vm0, %v424_v61  ;;  %442 = vst.msk [vmem:[%s911_s4 + $0x8] sm:$0xff] %vm440_vm0, %v425_v62  ;;  %v413_v8 = vadd.f32 %v386_v4, %v317_v56 }
  0xa6   : > { %v430_v13 = vmax.f32 %v414_v5, 0.0  ;;  %v431_v14 = vmax.f32 %v415_v6, 0.0  ;;  %v428_v15 = vmax.f32 %v412_v7, 0.0 }
  0xa7   : > { %v429_v16 = vmax.f32 %v413_v8, 0.0  ;;  %v398_v17 = vpop.permute.xlu1 %397  ;;  %v394_v18 = vpop.permute.xlu0 %393 }
  0xa8   : > { %447 = vst.msk [vmem:[%s911_s4 + $0x30] sm:$0xff] %vm440_vm0, %v430_v13  ;;  %448 = vst.msk [vmem:[%s911_s4 + $0x38] sm:$0xff] %vm440_vm0, %v431_v14  ;;  %v418_v19 = vadd.f32 %v398_v17, %v322_v9  ;;  %v419_v20 = vadd.f32 %v398_v17, %v323_v10  ;;  %v416_v21 = vadd.f32 %v394_v18, %v320_v11 }
  0xa9   : > { %445 = vst.msk [vmem:[%s911_s4 + $0x20] sm:$0xff] %vm440_vm0, %v428_v15  ;;  %446 = vst.msk [vmem:[%s911_s4 + $0x28] sm:$0xff] %vm440_vm0, %v429_v16  ;;  %v417_v22 = vadd.f32 %v394_v18, %v321_v12 }
  0xaa   : > { %v434_v27 = vmax.f32 %v418_v19, 0.0  ;;  %v435_v28 = vmax.f32 %v419_v20, 0.0  ;;  %v432_v29 = vmax.f32 %v416_v21, 0.0 }
  0xab   : > { %v433_v30 = vmax.f32 %v417_v22, 0.0  ;;  %v406_v31 = vpop.permute.xlu1 %405  ;;  %v402_v34 = vpop.permute.xlu0 %401 }
  0xac   : > { %451 = vst.msk [vmem:[%s911_s4 + $0x50] sm:$0xff] %vm440_vm0, %v434_v27  ;;  %452 = vst.msk [vmem:[%s911_s4 + $0x58] sm:$0xff] %vm440_vm0, %v435_v28  ;;  %v422_v32 = vadd.f32 %v406_v31, %v326_v23  ;;  %v423_v33 = vadd.f32 %v406_v31, %v327_v24  ;;  %v420_v35 = vadd.f32 %v402_v34, %v324_v25 }
  0xad   : > { %449 = vst.msk [vmem:[%s911_s4 + $0x40] sm:$0xff] %vm440_vm0, %v432_v29  ;;  %450 = vst.msk [vmem:[%s911_s4 + $0x48] sm:$0xff] %vm440_vm0, %v433_v30  ;;  %v421_v36 = vadd.f32 %v402_v34, %v325_v26 }
  0xae   : > { %v438_v37 = vmax.f32 %v422_v32, 0.0  ;;  %v439_v38 = vmax.f32 %v423_v33, 0.0  ;;  %v436_v39 = vmax.f32 %v420_v35, 0.0 }
  0xaf   : > { %v437_v40 = vmax.f32 %v421_v36, 0.0 }
  0xb0   : > { %455 = vst.msk [vmem:[%s911_s4 + $0x70] sm:$0xff] %vm440_vm0, %v438_v37  ;;  %456 = vst.msk [vmem:[%s911_s4 + $0x78] sm:$0xff] %vm440_vm0, %v439_v38 }
  0xb1   : > { %453 = vst.msk [vmem:[%s911_s4 + $0x60] sm:$0xff] %vm440_vm0, %v436_v39  ;;  %454 = vst.msk [vmem:[%s911_s4 + $0x68] sm:$0xff] %vm440_vm0, %v437_v40 }
  0xb2   : > { %695 = shalt.err (!%p692_p5)
}
  0xb3   : > { %s696_s21 = scalar_lea.hbm %s946_s8, 2048  ;;  %s700_s27 = scalar_lea.hbm %s1009_s3, 4096 }
  0xb4   : > { %p697_p6 = scmp.ne.s32.totalorder %s946_s8, %s696_s21  ;;  %p701_p10 = scmp.lt.u32.totalorder %s946_s8, %s1009_s3 }
  0xb5   : > { %p702_p11 = scmp.lt.u32.totalorder %s700_s27, %s696_s21  ;;  %p704_p13 = scmp.lt.u32.totalorder %s696_s21, %s946_s8 }
  0xb6   : > { %p698_p7 = pnand %p697_p6, %p826_p4 }
  0xb7   : > { %p703_p12 = por %p702_p11, %p701_p10 }
  0xb8   : > { %p699_p9 = pneg %p698_p7 }
  0xb9   : > { %p705_p0 = por %p704_p13, %p703_p12 }
  0xbb   : > { %p706_p1 = pnand %p705_p0, %p699_p9 }
  0xbd   : > { %709 = shalt.err (!%p706_p1)
}
  0xbe   : > { %s764_s30 = smov 128   ;;  %s765_s4 = smov 8  }
  0xbf   : > { %622 = dma.vmem_to_hbm [thread:$0]  (%p826_p4), %s948_s6, 2048, %s946_s8, %s960_s9, %s764_s30, %s764_s30, %s765_s4  }
  0xc0 PF: > { %p628_p2 = scmp.ge.s32.totalorder %s760_s17, 2  ;;  %s488_s5 = sand.u32 1, %s740_s12  }
  0xc1   : > { %s489_s15 = scalar_lea.sflag [#allocation3], %s488_s5 }
  0xc2   : > { %p625_p3 = pnand %p628_p2, %p833_p8 }
  0xc4   : > { %735 = dma.done.wait (!%p625_p3), %s489_s15, 2048  }
  0xc5   : > { %737 = vsyncadd (!%p625_p3), %s489_s15, 4294965248  ;;  %s16_s17 = sadd.s32 1, %s760_s17   ;;  %s1012_s12 = smov %s744_s13 }
  0xc6   : > { %p13_p5 = scmp.ge.s32.totalorder %s16_s17, 4   ;;  %s1013_s13 = smov %s748_s14 }
  0xc7   : > { %s1014_s14 = smov %s839_s25  ;;  %s1015_s15 = smov %s756_s16 }
  0xc8   : > { %s1016_s16 = smov %s1018_s20  ;;  %15 = sbr.rel (!%p13_p5) target bundleno = 4 (0x4), region = 67 }
  0xcf   :  { %494 = vsyncpa [#allocation3], 1 }
  0xd0   :  { %496 = vsyncpa [#allocation3 + $0x1], 1 }

// kernel: conv2d_bn_relu.2
= control target key start
LH: loop header
LB: loop body
LE: loop exit
PB: predicated region body
PF: predicated region fallthrough
CT: control target
= control target key end

     0   :  { %s2331_s15 = smov 0   ;;  %s2333_s16 = smov 0   ;;  %s2507_s0 = inlined_call_operand.vmem [shape: f32[9,8,4], index: 0, kind: input, shape index: {}]   ;;  %s2508_s1 = inlined_call_operand.vmem [shape: bf16[2,1,4,326], index: 1, kind: input, shape index: {}]   ;;  %s2509_s2 = inlined_call_operand.vmem [shape: bf16[1,288], index: 2, kind: input, shape index: {}]   ;;  %s2510_s3 = inlined_call_operand.vmem [shape: bf16[2,8,288], index: 3, kind: output, shape index: {0}]   ;;  %s2511_s4 = inlined_call_operand.vmem [shape: f32[2,1,8,2], index: 4, kind: output, shape index: {1}]  }
   0x1   :  { %s2335_s17 = smov 0  }
   0x2 LB: > { %s27_s18 = sadd.s32 1, %s2290_s16  ;;  %p2070_p0 = scmp.ge.s32.totalorder %s2294_s17, 1  ;;  %s2294_s17 = sphi %s2335_s17, %s15_s17   ;;  %s2290_s16 = sphi %s2333_s16, %s2513_s16   ;;  %s2286_s15 = sphi %s2331_s15, %s2512_s15  }
   0x3   : > { %p29_p1 = scmp.ge.s32.totalorder %s27_s18, 2  ;;  %p197_p2 = scmp.lt.s32.totalorder %s2294_s17, 3 }
   0x5   : > { %s2515_s18 = smov (%p29_p1, %s27_s18), 0  ;;  %p198_p3 = pnand %p2070_p0, %p197_p2 }
   0x6   : > { %p242_p4 = scmp.lt.s32.totalorder (!%p198_p3), %s2286_s15, 1  ;;  %v2296_v0 = vmov (!%p198_p3), 0.0   ;;  %vm2297_vm0 = vmmov (!%p198_p3), 0   ;;  %s2298_s23 = smov (!%p198_p3), 127   ;;  %vm291_vm1 = vcmask (!%p198_p3), 1043456   ;;  %v281_v21 = vld [vmem:[%s2507_s0] sm:$0xff] (!%p198_p3) }
   0x7   : > { %201 = sbr.rel (%p198_p3) target bundleno = 585 (0x249), region = 32  ;;  %362 = vmatprep.mubr.f32.mxu0 (!%p198_p3), %v2296_v0  ;;  %2151 = vmatprep.subr.mxu1 (!%p198_p3), %v2296_v0  ;;  %s2299_s24 = smov (!%p198_p3), 126   ;;  %vm287_vm2 = vcmask (!%p198_p3), 31744   ;;  %vm275_vm3 = vcmask (!%p198_p3), 261120   ;;  %vm462_vm4 = vcmask (!%p198_p3), 1039360   ;;  %vm638_vm5 = vcmask (!%p198_p3), 1031168  }
   0x8   : > { %2153 = vmatprep.mubr.msk.f32.mxu1 (!%p198_p3), %vm2297_vm0, %v2296_v0  ;;  %s2300_s27 = smov (!%p198_p3), 110   ;;  %s2301_s28 = smov (!%p198_p3), 109   ;;  %276 = vst.msk [vmem:[#allocation2 + $0x10] sm:$0xff] (!%p198_p3), %vm275_vm3, %v2296_v0  ;;  %v2079_v50 = vld [vmem:[%s2507_s0 + $0x8] sm:$0xff] (!%p198_p3)  ;;  %v2085_v59 = vld [vmem:[%s2507_s0 + $0x10] sm:$0xff] (!%p198_p3)  ;;  %vm814_vm6 = vcmask (!%p198_p3), 900096  }
   0x9   : > { %s2302_s29 = smov (!%p198_p3), 108   ;;  %s2303_s30 = smov (!%p198_p3), 92   ;;  %vm990_vm7 = vcmask (!%p198_p3), 891904   ;;  %vm1166_vm8 = vcmask (!%p198_p3), 883712   ;;  %vm1342_vm9 = vcmask (!%p198_p3), 752640   ;;  %vm1518_vm10 = vcmask (!%p198_p3), 744448  }
   0xa   : > { %s2304_s5 = smov (!%p198_p3), 91   ;;  %s2305_s6 = smov (!%p198_p3), 90   ;;  %vm1694_vm11 = vcmask (!%p198_p3), 736256   ;;  %vm1870_vm12 = vcmask (!%p198_p3), 257024   ;;  %vm1910_vm13 = vcmask (!%p198_p3), 7168   ;;  %vm1920_vm14 = vcmask (!%p198_p3), 15368  }
   0xe   : > { %s2517_s15 = smov (!%p242_p4, %s2286_s15), 1 }
   0xf   : > { %s2196_s19 = smul.u32 6, %s2517_s15  ;;  %s2073_s7 = sshll.u32 %s2517_s15, 3 }
  0x10   : > { %s272_s10 = scalar_lea.vmem %s2511_s4, %s2073_s7 }
  0x11   : > { %s2359_s22 = scalar_lea.vmem %s2508_s1, %s2196_s19 }
  0x12   : > { %v445_v1 = vld [vmem:[%s2359_s22] sm:$0x3f] }
  0x13   : > { %v621_v2 = vld [vmem:[%s2359_s22] sm:$0x3f]  ;;  %v451_v4 = vunpack.c.l.bf16 %v445_v1  ;;  %v452_v5 = vunpack.c.h.bf16 %v445_v1  ;;  %v2091_v1 = vld [vmem:[%s2507_s0 + $0x18] sm:$0xff] }
  0x14   : > { %v797_v3 = vld [vmem:[%s2359_s22] sm:$0x3f]  ;;  %v627_v6 = vunpack.c.l.bf16 %v621_v2  ;;  %v628_v7 = vunpack.c.h.bf16 %v621_v2 }
  0x15   : > { %v455_v8 = vcombine.high %v451_v4, %v451_v4  ;;  %v803_v10 = vunpack.c.l.bf16 %v797_v3  ;;  %v973_v11 = vld [vmem:[%s2359_s22] sm:$0x3f]  ;;  %v804_v15 = vunpack.c.h.bf16 %v797_v3 }
  0x16   : > { %v631_v9 = vcombine.high %v627_v6, %v627_v6  ;;  %v277_v14 = vld [vmem:[%s2359_s22] sm:$0x3f]  ;;  %v979_v17 = vunpack.c.l.bf16 %v973_v11  ;;  %v980_v24 = vunpack.c.h.bf16 %v973_v11 }
  0x17   : > { %v2232_v12 = vpack.i.bf16 %v452_v5, %v455_v8  ;;  %v807_v16 = vcombine.high %v803_v10, %v803_v10  ;;  %v1149_v18 = vld [vmem:[%s2359_s22] sm:$0x3f]  ;;  %v282_v19 = vunpack.c.l.bf16 %v277_v14  ;;  %v283_v20 = vunpack.c.h.bf16 %v277_v14 }
  0x18   : > { %v2237_v13 = vpack.i.bf16 %v628_v7, %v631_v9  ;;  %v983_v25 = vcombine.high %v979_v17, %v979_v17  ;;  %v1155_v26 = vunpack.c.l.bf16 %v1149_v18  ;;  %v1325_v27 = vld [vmem:[%s2359_s22] sm:$0x3f]  ;;  %v1156_v29 = vunpack.c.h.bf16 %v1149_v18 }
  0x19   : > { %2233 = vrot.lane.b32.xlu0 %v2232_v12, %s2298_s23  ;;  %v286_v22 = vcombine.high %v282_v19, %v282_v19  ;;  %2152 = vmatpush3.msk.msra.mxu1 %vm291_vm1, %v283_v20  ;;  %v2242_v23 = vpack.i.bf16 %v804_v15, %v807_v16  ;;  %v1331_v31 = vunpack.c.l.bf16 %v1325_v27  ;;  %v1501_v32 = vld [vmem:[%s2359_s22] sm:$0x3f]  ;;  %v1332_v34 = vunpack.c.h.bf16 %v1325_v27  ;;  %v2103_v15 = vld [vmem:[%s2507_s0 + $0x28] sm:$0xff] }
  0x1a   : > { %2238 = vrot.lane.b32.xlu1 %v2237_v13, %s2299_s24  ;;  %2154 = vmatmul.mubr.msk.f32.vlgmr.msra.gmra.mrb[0].mxu1 %vm287_vm2, %v281_v21  ;;  %v2247_v28 = vpack.i.bf16 %v980_v24, %v983_v25  ;;  %v1159_v30 = vcombine.high %v1155_v26, %v1155_v26  ;;  %v1507_v36 = vunpack.c.l.bf16 %v1501_v32  ;;  %v1677_v37 = vld [vmem:[%s2359_s22] sm:$0x3f]  ;;  %v1508_v39 = vunpack.c.h.bf16 %v1501_v32 }
  0x1b   : > { %2074 = vmatprep.subr.msk.mxu0 %vm291_vm1, %v286_v22  ;;  %2156 = vmatprep.subr.mxu1 %v2296_v0  ;;  %v1335_v35 = vcombine.high %v1331_v31, %v1331_v31  ;;  %v1683_v41 = vunpack.c.l.bf16 %v1677_v37  ;;  %v1684_v43 = vunpack.c.h.bf16 %v1677_v37  ;;  %v2097_v8 = vld [vmem:[%s2507_s0 + $0x20] sm:$0xff]  ;;  %v2109_v22 = vld [vmem:[%s2507_s0 + $0x30] sm:$0xff] }
  0x1c   : > { %2075 = vmatpush1.msk.msra.mxu0 %vm291_vm1, %v282_v19  ;;  %2158 = vmatprep.mubr.msk.f32.mxu1 %vm2297_vm0, %v2296_v0  ;;  %v2252_v33 = vpack.i.bf16 %v1156_v29, %v1159_v30  ;;  %v1511_v40 = vcombine.high %v1507_v36, %v1507_v36 }
  0x1d   : > { %456 = vrot.lane.b32.xlu0 %v451_v4, %s2298_s23  ;;  %2076 = vmatmul.mubr.msk.f32.vlgmr.msra.gmra.mrb[0].mxu0 %vm287_vm2, %v281_v21  ;;  %v2257_v38 = vpack.i.bf16 %v1332_v34, %v1335_v35  ;;  %v1687_v44 = vcombine.high %v1683_v41, %v1683_v41 }
  0x1e   : > { %632 = vrot.lane.b32.xlu1 %v627_v6, %s2299_s24  ;;  %538 = vmatprep.mubr.f32.mxu0 %v2296_v0  ;;  %v2262_v42 = vpack.i.bf16 %v1508_v39, %v1511_v40  ;;  %v280_v39 = vld [vmem:[#allocation2 + $0x10] sm:$0xff] }
  0x1f   : > { %v2267_v45 = vpack.i.bf16 %v1684_v43, %v1687_v44 }
  0x21   : > { %2243 = vrot.lane.b32.xlu0 %v2242_v23, %s2300_s27 }
  0x22   : > { %808 = vrot.lane.b32.xlu1 %v803_v10, %s2300_s27 }
  0x25   : > { %2248 = vrot.lane.b32.xlu0 %v2247_v28, %s2301_s28 }
  0x26   : > { %984 = vrot.lane.b32.xlu1 %v979_v17, %s2301_s28 }
  0x29   : > { %2253 = vrot.lane.b32.xlu0 %v2252_v33, %s2302_s29 }
  0x2a   : > { %1160 = vrot.lane.b32.xlu1 %v1155_v26, %s2302_s29  ;;  %s2197_s29 = smul.u32 12, %s2517_s15 }
  0x2d   : > { %2258 = vrot.lane.b32.xlu0 %v2257_v38, %s2303_s30  ;;  %v2121_v38 = vld [vmem:[%s2507_s0 + $0x40] sm:$0xff] }
  0x2e   : > { %1336 = vrot.lane.b32.xlu1 %v1331_v31, %s2303_s30  ;;  %v2115_v31 = vld [vmem:[%s2507_s0 + $0x38] sm:$0xff] }
  0x31   : > { %2263 = vrot.lane.b32.xlu0 %v2262_v42, %s2304_s5 }
  0x32   : > { %1512 = vrot.lane.b32.xlu1 %v1507_v36, %s2304_s5 }
  0x35   : > { %2268 = vrot.lane.b32.xlu0 %v2267_v45, %s2305_s6 }
  0x36   : > { %1688 = vrot.lane.b32.xlu1 %v1683_v41, %s2305_s6  ;;  %s264_s6 = scalar_lea.vmem %s2510_s3, %s2197_s29 }
  0x8b   : > { %v2234_v46 = vpop.permute.xlu0 %2233 }
  0x8c   : > { %v2239_v47 = vpop.permute.xlu1 %2238  ;;  %v2236_v48 = vunpack.i.h.bf16 %v2234_v46  ;;  %v2235_v49 = vunpack.i.l.bf16 %v2234_v46 }
  0x8d   : > { %v2241_v51 = vunpack.i.h.bf16 %v2239_v47  ;;  %v2240_v52 = vunpack.i.l.bf16 %v2239_v47 }
  0x8e   : > { %2157 = vmatpush3.msk.msra.mxu1 %vm291_vm1, %v2236_v48  ;;  %v464_v53 = vsel %vm462_vm4, %v2235_v49, %v2236_v48 }
  0x8f   : > { %v457_v54 = vpop.permute.xlu0 %456  ;;  %2080 = vmatprep.subr.msk.mxu0 %vm291_vm1, %v464_v53  ;;  %2159 = vmatmul.mubr.msk.f32.vlgmr.msra.gmra.mrb[2].mxu1 %vm287_vm2, %v2079_v50  ;;  %v640_v56 = vsel %vm638_vm5, %v2240_v52, %v2241_v51 }
  0x90   : > { %v633_v55 = vpop.permute.xlu1 %632  ;;  %v463_v57 = vsel %vm462_vm4, %v457_v54, %v2235_v49  ;;  %2161 = vmatprep.subr.mxu1 %v2296_v0  ;;  %2163 = vmatprep.mubr.msk.f32.mxu1 %vm2297_vm0, %v2296_v0 }
  0x91   : > { %v639_v58 = vsel %vm638_vm5, %v633_v55, %v2240_v52  ;;  %2081 = vmatpush1.msk.msra.mxu0 %vm291_vm1, %v463_v57  ;;  %2162 = vmatpush3.msk.msra.mxu1 %vm291_vm1, %v2241_v51 }
  0x92   : > { %2082 = vmatmul.mubr.msk.f32.vlgmr.msra.gmra.mrb[2].mxu0 %vm287_vm2, %v2079_v50  ;;  %2086 = vmatprep.subr.msk.mxu0 %vm291_vm1, %v640_v56 }
  0x93   : > { %2087 = vmatpush1.msk.msra.mxu0 %vm291_vm1, %v639_v58  ;;  %714 = vmatprep.mubr.f32.mxu0 %v2296_v0  ;;  %v2244_v60 = vpop.permute.xlu0 %2243 }
  0x94   : > { %v809_v61 = vpop.permute.xlu1 %808  ;;  %2164 = vmatmul.mubr.msk.f32.vlgmr.msra.gmra.mrb[4].mxu1 %vm287_vm2, %v2085_v59  ;;  %v2246_v62 = vunpack.i.h.bf16 %v2244_v60  ;;  %v2245_v63 = vunpack.i.l.bf16 %v2244_v60  ;;  %2166 = vmatprep.subr.mxu1 %v2296_v0 }
  0x95   : > { %2168 = vmatprep.mubr.msk.f32.mxu1 %vm2297_vm0, %v2296_v0 }
  0x96   : > { %2088 = vmatmul.mubr.msk.f32.vlgmr.msra.gmra.mrb[4].mxu0 %vm287_vm2, %v2085_v59  ;;  %v815_v2 = vsel %vm814_vm6, %v809_v61, %v2245_v63  ;;  %v816_v3 = vsel %vm814_vm6, %v2245_v63, %v2246_v62  ;;  %2167 = vmatpush3.msk.msra.mxu1 %vm291_vm1, %v2246_v62 }
  0x97   : > { %2092 = vmatprep.subr.msk.mxu0 %vm291_vm1, %v816_v3  ;;  %890 = vmatprep.mubr.f32.mxu0 %v2296_v0  ;;  %v2249_v4 = vpop.permute.xlu0 %2248 }
  0x98   : > { %v985_v5 = vpop.permute.xlu1 %984  ;;  %2093 = vmatpush1.msk.msra.mxu0 %vm291_vm1, %v815_v2  ;;  %2169 = vmatmul.mubr.msk.f32.vlgmr.msra.gmra.mrb[6].mxu1 %vm287_vm2, %v2091_v1  ;;  %v2251_v6 = vunpack.i.h.bf16 %v2249_v4  ;;  %v2250_v7 = vunpack.i.l.bf16 %v2249_v4 }
  0x99   : > { %2171 = vmatprep.subr.mxu1 %v2296_v0  ;;  %2173 = vmatprep.mubr.msk.f32.mxu1 %vm2297_vm0, %v2296_v0 }
  0x9a   : > { %2094 = vmatmul.mubr.msk.f32.vlgmr.msra.gmra.mrb[6].mxu0 %vm287_vm2, %v2091_v1  ;;  %v991_v9 = vsel %vm990_vm7, %v985_v5, %v2250_v7  ;;  %v992_v10 = vsel %vm990_vm7, %v2250_v7, %v2251_v6  ;;  %2172 = vmatpush3.msk.msra.mxu1 %vm291_vm1, %v2251_v6  ;;  %v1875_v5 = vlaneseq }
  0x9b   : > { %2098 = vmatprep.subr.msk.mxu0 %vm291_vm1, %v992_v10  ;;  %1066 = vmatprep.mubr.f32.mxu0 %v2296_v0  ;;  %v2254_v11 = vpop.permute.xlu0 %2253 }
  0x9c   : > { %v1161_v12 = vpop.permute.xlu1 %1160  ;;  %2099 = vmatpush1.msk.msra.mxu0 %vm291_vm1, %v991_v9  ;;  %2174 = vmatmul.mubr.msk.f32.vlgmr.msra.gmra.mrb[8].mxu1 %vm287_vm2, %v2097_v8  ;;  %v2256_v13 = vunpack.i.h.bf16 %v2254_v11  ;;  %v2255_v14 = vunpack.i.l.bf16 %v2254_v11 }
  0x9d   : > { %2176 = vmatprep.subr.mxu1 %v2296_v0  ;;  %2178 = vmatprep.mubr.msk.f32.mxu1 %vm2297_vm0, %v2296_v0 }
  0x9e   : > { %2100 = vmatmul.mubr.msk.f32.vlgmr.msra.gmra.mrb[8].mxu0 %vm287_vm2, %v2097_v8  ;;  %v1167_v16 = vsel %vm1166_vm8, %v1161_v12, %v2255_v14  ;;  %v1168_v17 = vsel %vm1166_vm8, %v2255_v14, %v2256_v13  ;;  %2177 = vmatpush3.msk.msra.mxu1 %vm291_vm1, %v2256_v13  ;;  %v1876_v12 = vshrl.u32 %v1875_v5, 7  ;;  %v1872_v14 = vld [vmem:[%s2509_s2] sm:$0x7] }
  0x9f   : > { %2104 = vmatprep.subr.msk.mxu0 %vm291_vm1, %v1168_v17  ;;  %1242 = vmatprep.mubr.f32.mxu0 %v2296_v0  ;;  %v2259_v18 = vpop.permute.xlu0 %2258 }
  0xa0   : > { %v1337_v19 = vpop.permute.xlu1 %1336  ;;  %2105 = vmatpush1.msk.msra.mxu0 %vm291_vm1, %v1167_v16  ;;  %2179 = vmatmul.mubr.msk.f32.vlgmr.msra.gmra.mrb[10].mxu1 %vm287_vm2, %v2103_v15  ;;  %v2261_v20 = vunpack.i.h.bf16 %v2259_v18  ;;  %v2260_v21 = vunpack.i.l.bf16 %v2259_v18 }
  0xa1   : > { %2181 = vmatprep.subr.mxu1 %v2296_v0  ;;  %2183 = vmatprep.mubr.msk.f32.mxu1 %vm2297_vm0, %v2296_v0 }
  0xa2   : > { %2106 = vmatmul.mubr.msk.f32.vlgmr.msra.gmra.mrb[10].mxu0 %vm287_vm2, %v2103_v15  ;;  %v1343_v23 = vsel %vm1342_vm9, %v1337_v19, %v2260_v21  ;;  %v1344_v24 = vsel %vm1342_vm9, %v2260_v21, %v2261_v20  ;;  %2182 = vmatpush3.msk.msra.mxu1 %vm291_vm1, %v2261_v20 }
  0xa3   : > { %2110 = vmatprep.subr.msk.mxu0 %vm291_vm1, %v1344_v24  ;;  %1418 = vmatprep.mubr.f32.mxu0 %v2296_v0  ;;  %v2264_v25 = vpop.permute.xlu0 %2263 }
  0xa4   : > { %v1513_v26 = vpop.permute.xlu1 %1512  ;;  %2111 = vmatpush1.msk.msra.mxu0 %vm291_vm1, %v1343_v23  ;;  %2184 = vmatmul.mubr.msk.f32.vlgmr.msra.gmra.mrb[12].mxu1 %vm287_vm2, %v2109_v22  ;;  %v2266_v27 = vunpack.i.h.bf16 %v2264_v25  ;;  %v2265_v28 = vunpack.i.l.bf16 %v2264_v25  ;;  %v1877_v23 = vsub.s32 0, %v1876_v12  ;;  %v1881_v25 = vsub.s32 2, %v1876_v12 }
  0xa5   : > { %2186 = vmatprep.subr.mxu1 %v2296_v0  ;;  %2188 = vmatprep.mubr.msk.f32.mxu1 %vm2297_vm0, %v2296_v0 }
  0xa6   : > { %2112 = vmatmul.mubr.msk.f32.vlgmr.msra.gmra.mrb[12].mxu0 %vm287_vm2, %v2109_v22  ;;  %v1519_v29 = vsel %vm1518_vm10, %v1513_v26, %v2265_v28  ;;  %v1520_v30 = vsel %vm1518_vm10, %v2265_v28, %v2266_v27  ;;  %2187 = vmatpush3.msk.msra.mxu1 %vm291_vm1, %v2266_v27  ;;  %v1873_v22 = vunpack.c.l.bf16 %v1872_v14 }
  0xa7   : > { %2116 = vmatprep.subr.msk.mxu0 %vm291_vm1, %v1520_v30  ;;  %1594 = vmatprep.mubr.f32.mxu0 %v2296_v0  ;;  %v2269_v32 = vpop.permute.xlu0 %2268 }
  0xa8   : > { %v1689_v33 = vpop.permute.xlu1 %1688  ;;  %2117 = vmatpush1.msk.msra.mxu0 %vm291_vm1, %v1519_v29  ;;  %2189 = vmatmul.mubr.msk.f32.vlgmr.msra.gmra.mrb[14].mxu1 %vm287_vm2, %v2115_v31  ;;  %v2271_v34 = vunpack.i.h.bf16 %v2269_v32  ;;  %v2270_v35 = vunpack.i.l.bf16 %v2269_v32 }
  0xa9   : > { %2191 = vmatprep.subr.mxu1 %v2296_v0  ;;  %2193 = vmatprep.mubr.msk.f32.mxu1 %vm2297_vm0, %v2296_v0 }
  0xaa   : > { %2118 = vmatmul.mubr.msk.f32.vlgmr.msra.gmra.mrb[14].mxu0 %vm287_vm2, %v2115_v31  ;;  %v1695_v36 = vsel %vm1694_vm11, %v1689_v33, %v2270_v35  ;;  %v1696_v37 = vsel %vm1694_vm11, %v2270_v35, %v2271_v34  ;;  %2192 = vmatpush3.msk.msra.mxu1 %vm291_vm1, %v2271_v34  ;;  %v1878_v31 = vrot.slane %v1873_v22, %v1877_v23 }
  0xab   : > { %2122 = vmatprep.subr.msk.mxu0 %vm291_vm1, %v1696_v37  ;;  %1770 = vmatprep.mubr.f32.mxu0 %v2296_v0  ;;  %v1882_v33 = vrot.slane %v1873_v22, %v1881_v25 }
  0xac   : > { %2123 = vmatpush1.msk.msra.mxu0 %vm291_vm1, %v1695_v36  ;;  %2194 = vmatmul.mubr.msk.f32.vlgmr.msra.gmra.mrb[16].mxu1 %vm287_vm2, %v2121_v38 }
  0xae   : > { %2124 = vmatmul.mubr.msk.f32.vlgmr.msra.gmra.mrb[16].mxu0 %vm287_vm2, %v2121_v38 }
  0xed   : > { %v435_v40 = vpop.f32.mrb[0].mxu1 }
  0xee   : > { %v441_v41 = vadd.f32 %v435_v40, %v280_v39  ;;  %v2155_v42 = vpop.f32.mrb[1].mxu1  ;;  %v1893_v40 = vrot.slane %v1878_v31, %v1877_v23 }
  0xf0   : > { %v364_v43 = vpop.f32.mrb[0].mxu0  ;;  %444 = vst.msk [vmem:[#allocation2 + $0x10] sm:$0xff] %vm275_vm3, %v441_v41 }
  0xf1   : > { %v366_v44 = vpop.f32.mrb[1].mxu0 }
  0xf7   : > { %v448_v45 = vld [vmem:[#allocation2 + $0x10] sm:$0xff] }
 0x162   : > { %v611_v0 = vpop.f32.mrb[2].mxu1 }
 0x163   : > { %v617_v46 = vadd.f32 %v611_v0, %v448_v45  ;;  %v2160_v47 = vpop.f32.mrb[3].mxu1 }
 0x165   : > { %v540_v48 = vpop.f32.mrb[2].mxu0  ;;  %620 = vst.msk [vmem:[#allocation2 + $0x10] sm:$0xff] %vm275_vm3, %v617_v46 }
 0x166   : > { %v615_v49 = vadd.f32 %v540_v48, %v364_v43  ;;  %v542_v50 = vpop.f32.mrb[3].mxu0  ;;  %v1897_v43 = vrot.slane %v1882_v33, %v1877_v23 }
 0x167   : > { %v616_v51 = vadd.f32 %v542_v50, %v366_v44  ;;  %v787_v52 = vpop.f32.mrb[4].mxu1 }
 0x168   : > { %v2165_v53 = vpop.f32.mrb[5].mxu1 }
 0x169   : > { %v716_v54 = vpop.f32.mrb[4].mxu0 }
 0x16a   : > { %v791_v55 = vadd.f32 %v716_v54, %v615_v49  ;;  %v718_v56 = vpop.f32.mrb[5].mxu0 }
 0x16b   : > { %v792_v57 = vadd.f32 %v718_v56, %v616_v51  ;;  %v963_v58 = vpop.f32.mrb[6].mxu1 }
 0x16c   : > { %v624_v59 = vld [vmem:[#allocation2 + $0x10] sm:$0xff]  ;;  %v2170_v60 = vpop.f32.mrb[7].mxu1 }
 0x16d   : > { %v793_v61 = vadd.f32 %v787_v52, %v624_v59  ;;  %v892_v62 = vpop.f32.mrb[6].mxu0  ;;  %v1885_v59 = vsub.s32 4, %v1876_v12 }
 0x16e   : > { %v967_v63 = vadd.f32 %v892_v62, %v791_v55  ;;  %v894_v1 = vpop.f32.mrb[7].mxu0 }
 0x16f   : > { %796 = vst.msk [vmem:[#allocation2 + $0x10] sm:$0xff] %vm275_vm3, %v793_v61  ;;  %v968_v2 = vadd.f32 %v894_v1, %v792_v57  ;;  %v1139_v3 = vpop.f32.mrb[8].mxu1  ;;  %v1886_v62 = vrot.slane %v1873_v22, %v1885_v59 }
 0x170   : > { %v2175_v4 = vpop.f32.mrb[9].mxu1 }
 0x171   : > { %v1068_v6 = vpop.f32.mrb[8].mxu0 }
 0x172   : > { %v1143_v7 = vadd.f32 %v1068_v6, %v967_v63  ;;  %v1070_v8 = vpop.f32.mrb[9].mxu0  ;;  %v1901_v63 = vrot.slane %v1886_v62, %v1877_v23 }
 0x173   : > { %v1144_v9 = vadd.f32 %v1070_v8, %v968_v2  ;;  %v1315_v10 = vpop.f32.mrb[10].mxu1 }
 0x174   : > { %v2180_v11 = vpop.f32.mrb[11].mxu1 }
 0x175   : > { %v1244_v13 = vpop.f32.mrb[10].mxu0 }
 0x176   : > { %v800_v15 = vld [vmem:[#allocation2 + $0x10] sm:$0xff]  ;;  %v1319_v16 = vadd.f32 %v1244_v13, %v1143_v7  ;;  %v1246_v17 = vpop.f32.mrb[11].mxu0 }
 0x177   : > { %v969_v18 = vadd.f32 %v963_v58, %v800_v15  ;;  %v1320_v19 = vadd.f32 %v1246_v17, %v1144_v9  ;;  %v1491_v20 = vpop.f32.mrb[12].mxu1 }
 0x178   : > { %v2185_v21 = vpop.f32.mrb[13].mxu1 }
 0x179   : > { %972 = vst.msk [vmem:[#allocation2 + $0x10] sm:$0xff] %vm275_vm3, %v969_v18  ;;  %v1420_v24 = vpop.f32.mrb[12].mxu0 }
 0x17a   : > { %v1495_v26 = vadd.f32 %v1420_v24, %v1319_v16  ;;  %v1422_v27 = vpop.f32.mrb[13].mxu0 }
 0x17b   : > { %v1496_v28 = vadd.f32 %v1422_v27, %v1320_v19  ;;  %v1667_v29 = vpop.f32.mrb[14].mxu1 }
 0x17c   : > { %v2190_v30 = vpop.f32.mrb[15].mxu1 }
 0x17d   : > { %v1596_v32 = vpop.f32.mrb[14].mxu0 }
 0x17e   : > { %v1671_v34 = vadd.f32 %v1596_v32, %v1495_v26  ;;  %v1598_v35 = vpop.f32.mrb[15].mxu0 }
 0x17f   : > { %v1672_v36 = vadd.f32 %v1598_v35, %v1496_v28  ;;  %v1843_v37 = vpop.f32.mrb[16].mxu1 }
 0x180   : > { %v976_v38 = vld [vmem:[#allocation2 + $0x10] sm:$0xff]  ;;  %v2195_v39 = vpop.f32.mrb[17].mxu1 }
 0x181   : > { %v1145_v41 = vadd.f32 %v1139_v3, %v976_v38  ;;  %v1772_v42 = vpop.f32.mrb[16].mxu0 }
 0x182   : > { %v1847_v44 = vadd.f32 %v1772_v42, %v1671_v34  ;;  %v1774_v45 = vpop.f32.mrb[17].mxu0 }
 0x183   : > { %1148 = vst.msk [vmem:[#allocation2 + $0x10] sm:$0xff] %vm275_vm3, %v1145_v41  ;;  %v1848_v0 = vadd.f32 %v1774_v45, %v1672_v36 }
 0x184   : > { %v1902_v46 = vmul.f32 %v1893_v40, %v1847_v44 }
 0x185   : > { %v1903_v47 = vmul.f32 %v1897_v43, %v1848_v0  ;;  %v2131_v48 = vpack.c.bf16 %v1848_v0, %v1847_v44 }
 0x186   : > { %v1912_v49 = vmul.f32 %v1902_v46, %v1847_v44 }
 0x187   : > { %v1905_v50 = vadd.f32 %v1903_v47, %v1902_v46  ;;  %1869 = vst [vmem:[%s264_s6] sm:$0xff] %v2131_v48  ;;  %v1913_v51 = vmul.f32 %v1903_v47, %v1848_v0 }
 0x189   : > { %v1915_v52 = vadd.f32 %v1913_v51, %v1912_v49 }
 0x18a   : > { %v1152_v53 = vld [vmem:[#allocation2 + $0x10] sm:$0xff] }
 0x18b   : > { %v1321_v54 = vadd.f32 %v1315_v10, %v1152_v53 }
 0x18d   : > { %1324 = vst.msk [vmem:[#allocation2 + $0x10] sm:$0xff] %vm275_vm3, %v1321_v54 }
 0x194   : > { %v1328_v55 = vld [vmem:[#allocation2 + $0x10] sm:$0xff] }
 0x195   : > { %v1497_v56 = vadd.f32 %v1491_v20, %v1328_v55 }
 0x197   : > { %1500 = vst.msk [vmem:[#allocation2 + $0x10] sm:$0xff] %vm275_vm3, %v1497_v56 }
 0x19e   : > { %v1504_v57 = vld [vmem:[#allocation2 + $0x10] sm:$0xff] }
 0x19f   : > { %v1673_v58 = vadd.f32 %v1667_v29, %v1504_v57 }
 0x1a1   : > { %1676 = vst.msk [vmem:[#allocation2 + $0x10] sm:$0xff] %vm275_vm3, %v1673_v58 }
 0x1a8   : > { %v1680_v60 = vld [vmem:[#allocation2 + $0x10] sm:$0xff] }
 0x1a9   : > { %v1849_v61 = vadd.f32 %v1843_v37, %v1680_v60 }
 0x1ab   : > { %1852 = vst.msk [vmem:[#allocation2 + $0x10] sm:$0xff] %vm275_vm3, %v1849_v61 }
 0x1b2   : > { %v1855_v1 = vld [vmem:[#allocation2 + $0x10] sm:$0xff] }
 0x1b3   : > { %v2132_v2 = vpack.c.bf16 %v1855_v1, %v1855_v1  ;;  %v1904_v3 = vmul.f32 %v1901_v63, %v1855_v1 }
 0x1b5   : > { %1871 = vst.msk [vmem:[%s264_s6 + $0x8] sm:$0xf] %vm1870_vm12, %v2132_v2  ;;  %v1906_v4 = vsel %vm275_vm3, %v1904_v3, 0.0  ;;  %v1914_v5 = vmul.f32 %v1904_v3, %v1855_v1 }
 0x1b6   : > { %v1907_v6 = vadd.f32 %v1906_v4, %v1905_v50 }
 0x1b7   : > { %v1916_v7 = vsel %vm275_vm3, %v1914_v5, 0.0 }
 0x1b8   : > { %1908 = vadd.xlane.f32.xlu0 %v1907_v6  ;;  %v1917_v8 = vadd.f32 %v1916_v7, %v1915_v52 }
 0x1ba   : > { %1918 = vadd.xlane.f32.xlu1 %v1917_v8 }
 0x245   : > { %v1909_v9 = vpop.xlane.xlu0 %1908 }
 0x246   : > { %1911 = vst.msk [vmem:[%s272_s10] sm:$0xff] %vm1910_vm13, %v1909_v9 }
 0x247   : > { %v1919_v10 = vpop.xlane.xlu1 %1918 }
 0x248   : > { %1921 = vst.msk [vmem:[%s272_s10] sm:$0xff] %vm1920_vm14, %v1919_v10 }
 0x249 PF: > { %s15_s17 = sadd.s32 1, %s2294_s17   ;;  %s2512_s15 = smov %s2290_s16 }
 0x24a   : > { %p12_p5 = scmp.ge.s32.totalorder %s15_s17, 4   ;;  %s2513_s16 = smov %s2515_s18 }
 0x24c   :  { %14 = sbr.rel (!%p12_p5) target bundleno = 2 (0x2), region = 85 }

</bundles_post_ra>
